<compile_context>
chip_gen: v7x
topology: tpu7x:2x2x1
jax: 0.10.0
libtpu: 0.0.40
codegen_flags: <defaults>
</compile_context>

<pallas_src>
import functools

import jax
import jax.numpy as jnp
import numpy as np
from jax.experimental import pallas as pl
from jax.experimental.pallas import tpu as pltpu

_VMEM_LIMIT = 48 * 1024 * 1024   # fits v7x (64 MiB physical), harmless on v5e/v6e


# --------------------------------------------------------------------------
# Pass 1: BN1 batch statistics of the 1x1 conv output (bias dropped -- it
# cancels inside BatchNorm).  Zero-padded lanes contribute exactly 0 to both
# sums, so no validity mask is needed here.
# --------------------------------------------------------------------------
def _bn1_stats_kernel(xe_ref, xo_ref, w1a_ref, stats_ref):
    @pl.when(pl.program_id(0) == 0)
    def _init():
        stats_ref[...] = jnp.zeros_like(stats_ref)

    w = w1a_ref[...]
    ue = jnp.dot(w, xe_ref[...], preferred_element_type=jnp.float32)
    uo = jnp.dot(w, xo_ref[...], preferred_element_type=jnp.float32)
    stats_ref[:, 0:1] += jnp.sum(ue + uo, axis=1, keepdims=True)
    stats_ref[:, 1:2] += jnp.sum(ue * ue + uo * uo, axis=1, keepdims=True)


# --------------------------------------------------------------------------
# Pass 2: BN2 batch statistics of the strided k=3 conv (applied to the
# BN1-normalized + LeakyReLU activations; conv bias b1b dropped, it cancels).
# --------------------------------------------------------------------------
def _bn2_stats_kernel(xe_ref, xo_ref, xp_ref, mj_ref, w1a_ref, w1b_ref, vec_ref,
                      stats_ref, *, nlo, tile, need_mask):
    @pl.when(pl.program_id(0) == 0)
    def _init():
        stats_ref[...] = jnp.zeros_like(stats_ref)

    w1a = w1a_ref[...]
    scale1 = vec_ref[0]                      # (Cout, 1) fused BN1 scale
    shift1 = vec_ref[1]                      # (Cout, 1) fused BN1 shift
    w1b_l, w1b_c, w1b_r = w1b_ref[0], w1b_ref[1], w1b_ref[2]
    md = w1b_c.dtype

    def stage_a(x):                          # 1x1 conv -> BN1 affine -> LeakyReLU
        u = jnp.dot(w1a, x, preferred_element_type=jnp.float32)
        a = u * scale1 + shift1
        return jnp.where(a >= 0, a, 0.1 * a)

    ae = stage_a(xe_ref[...])
    ao = stage_a(xo_ref[...])
    ap = stage_a(xp_ref[...]) * mj_ref[...]  # zero the left tap where j == 0

    v = (jnp.dot(w1b_c, ae.astype(md), preferred_element_type=jnp.float32)
         + jnp.dot(w1b_r, ao.astype(md), preferred_element_type=jnp.float32)
         + jnp.dot(w1b_l, ap.astype(md), preferred_element_type=jnp.float32))

    if need_mask:                            # exclude lane-padding from stats
        g = (jax.lax.broadcasted_iota(jnp.int32, (1, tile), 1)
             + pl.program_id(0) * tile)
        valid = g < nlo
        sv = jnp.where(valid, v, 0.0)
        qv = jnp.where(valid, v * v, 0.0)
    else:
        sv, qv = v, v * v
    # TODO(synk): one-pass E[x^2]-E[x]^2 variance; switch to a shifted one-pass
    # if channel means ever dwarf the std.
    stats_ref[:, 0:1] += jnp.sum(sv, axis=1, keepdims=True)
    stats_ref[:, 1:2] += jnp.sum(qv, axis=1, keepdims=True)


# --------------------------------------------------------------------------
# Pass 3: apply everything and add branch 2.  Tiles are fully independent
# (masks + previous-odd taps come from tiled inputs) -> "parallel" grid axis.
# --------------------------------------------------------------------------
def _apply_kernel(xe_ref, xo_ref, xp_ref, mj_ref, w1a_ref, w1b_ref, w2_ref,
                  vec_ref, out_ref):
    w1a = w1a_ref[...]
    scale1, shift1 = vec_ref[0], vec_ref[1]
    scale2, shift2 = vec_ref[2], vec_ref[3]
    b2 = vec_ref[4]
    w1b_l, w1b_c, w1b_r = w1b_ref[0], w1b_ref[1], w1b_ref[2]
    w2_l, w2_c, w2_r = w2_ref[0], w2_ref[1], w2_ref[2]
    md = w1b_c.dtype

    xe, xo, xp = xe_ref[...], xo_ref[...], xp_ref[...]
    mj = mj_ref[...]

    def stage_a(x):
        u = jnp.dot(w1a, x, preferred_element_type=jnp.float32)
        a = u * scale1 + shift1
        return jnp.where(a >= 0, a, 0.1 * a)

    ae = stage_a(xe)
    ao = stage_a(xo)
    ap = stage_a(xp) * mj

    v = (jnp.dot(w1b_c, ae.astype(md), preferred_element_type=jnp.float32)
         + jnp.dot(w1b_r, ao.astype(md), preferred_element_type=jnp.float32)
         + jnp.dot(w1b_l, ap.astype(md), preferred_element_type=jnp.float32))
    z1 = v * scale2 + shift2
    z1 = jnp.where(z1 >= 0, z1, 0.1 * z1)

    z2 = (jnp.dot(w2_c, xe, preferred_element_type=jnp.float32)
          + jnp.dot(w2_r, xo, preferred_element_type=jnp.float32)
          + jnp.dot(w2_l, xp, preferred_element_type=jnp.float32)) + b2
    z2 = jnp.where(z2 >= 0, z2, 0.1 * z2)

    out_ref[...] = (z1 + z2).astype(out_ref.dtype)


# --------------------------------------------------------------------------
# Wrapper: parity-split im2col slabs, lane tiling, BN scale/shift folding.
# --------------------------------------------------------------------------
def resnet_ibn_forward(x, params, *, lane_tile=512, mxu_dtype=jnp.float32):
    n, cin, l = x.shape
    assert l % 2 == 0, "even sequence length expected"
    # TODO(synk): odd L needs an extra right-pad tap for the strided convs.
    cout = params['w1a'].shape[0]
    lout = (l + 2 - 3) // 2 + 1                 # == l // 2 for even l
    nlo = n * lout

    lane_tile = max(128, (lane_tile // 128) * 128)
    tile = min(lane_tile, ((nlo + 127) // 128) * 128)
    p = ((nlo + tile - 1) // tile) * tile
    grid_t = p // tile
    need_mask = (p != nlo)

    f32 = jnp.float32
    xr = jnp.transpose(x, (1, 0, 2)).astype(f32)          # (Cin, N, L)
    xe3 = xr[:, :, 0::2]                                   # center tap (k=1)
    xo3 = xr[:, :, 1::2]                                   # right tap  (k=2)
    xp3 = jnp.concatenate(                                 # left tap   (k=0)
        [jnp.zeros((cin, n, 1), f32), xo3[:, :, :-1]], axis=2)

    def slab(a):                                           # -> (Cin, P) lane-dense
        a = a.reshape(cin, nlo)
        return jnp.pad(a, ((0, 0), (0, p - nlo))).astype(mxu_dtype)

    xe, xo, xp = slab(xe3), slab(xo3), slab(xp3)

    w1a = params['w1a'].astype(mxu_dtype)                  # (Cout, Cin)
    w1b = params['w1b'].astype(mxu_dtype)                  # (3, Cout, Cout)
    w2 = params['w2'].astype(mxu_dtype)                    # (3, Cout, Cin)

    # "j != 0 within sample (and real column)" row, tiled with the slabs.
    col = jnp.arange(p, dtype=jnp.int32)
    mj = ((col < nlo) & (col % lout != 0)).astype(f32).reshape(1, p)

    cp_arb = pltpu.CompilerParams(dimension_semantics=("arbitrary",),
                                  vmem_limit_bytes=_VMEM_LIMIT)
    cp_par = pltpu.CompilerParams(dimension_semantics=("parallel",),
                                  vmem_limit_bytes=_VMEM_LIMIT)

    x_spec = pl.BlockSpec((cin, tile), lambda t: (0, t))
    mj_spec = pl.BlockSpec((1, tile), lambda t: (0, t))
    w1a_spec = pl.BlockSpec((cout, cin), lambda t: (0, 0))
    w1b_spec = pl.BlockSpec((3, cout, cout), lambda t: (0, 0, 0))
    w2_spec = pl.BlockSpec((3, cout, cin), lambda t: (0, 0, 0))
    stats_spec = pl.BlockSpec((cout, 2), lambda t: (0, 0))

    # ---- pass 1: BN1 batch stats -----------------------------------------
    stats1 = pl.pallas_call(
        _bn1_stats_kernel,
        grid=(grid_t,),
        out_shape=jax.ShapeDtypeStruct((cout, 2), f32),
        in_specs=[x_spec, x_spec, w1a_spec],
        out_specs=stats_spec,
        compiler_params=cp_arb,
    )(xe, xo, w1a)

    eps = 1e-5
    nv1 = float(n * l)
    mean1 = stats1[:, 0:1] / nv1
    var1 = stats1[:, 1:2] / nv1 - mean1 * mean1
    scale1 = params['g1a'].astype(f32) * jax.lax.rsqrt(var1 + eps)
    shift1 = params['be1a'].astype(f32) - mean1 * scale1   # conv bias b1a cancels
    vec2 = jnp.stack([scale1, shift1], axis=0)             # (2, Cout, 1)

    # ---- pass 2: BN2 batch stats -----------------------------------------
    stats2 = pl.pallas_call(
        functools.partial(_bn2_stats_kernel, nlo=nlo, tile=tile,
                          need_mask=need_mask),
        grid=(grid_t,),
        out_shape=jax.ShapeDtypeStruct((cout, 2), f32),
        in_specs=[x_spec, x_spec, x_spec, mj_spec, w1a_spec, w1b_spec,
                  pl.BlockSpec((2, cout, 1), lambda t: (0, 0, 0))],
        out_specs=stats_spec,
        compiler_params=cp_arb,
    )(xe, xo, xp, mj, w1a, w1b, vec2)

    nv2 = float(nlo)
    mean2 = stats2[:, 0:1] / nv2
    var2 = stats2[:, 1:2] / nv2 - mean2 * mean2
    scale2 = params['g1b'].astype(f32) * jax.lax.rsqrt(var2 + eps)
    shift2 = params['be1b'].astype(f32) - mean2 * scale2   # conv bias b1b cancels
    vec3 = jnp.stack([scale1, shift1, scale2, shift2,
                      params['b2'].astype(f32)], axis=0)   # (5, Cout, 1)

    # ---- pass 3: apply + branch 2, lane-parallel (megacore on v7x) --------
    out_pad = pl.pallas_call(
        _apply_kernel,
        grid=(grid_t,),
        out_shape=jax.ShapeDtypeStruct((cout, p), f32),
        in_specs=[x_spec, x_spec, x_spec, mj_spec, w1a_spec, w1b_spec, w2_spec,
                  pl.BlockSpec((5, cout, 1), lambda t: (0, 0, 0))],
        out_specs=pl.BlockSpec((cout, tile), lambda t: (0, t)),
        compiler_params=cp_par,
    )(xe, xo, xp, mj, w1a, w1b, w2, vec3)

    out = out_pad[:, :nlo].reshape(cout, n, lout)
    return jnp.transpose(out, (1, 0, 2))                   # (N, Cout, Lout)


# --------------------------------------------------------------------------
# Pure-JAX reference (independent path through lax.conv) for verification.
# --------------------------------------------------------------------------
def resnet_ibn_reference(x, params):
    hi = jax.lax.Precision.HIGHEST

    def conv1d(inp, w, b, stride, pad):
        out = jax.lax.conv_general_dilated(
            inp, w, window_strides=(stride,), padding=[(pad, pad)],
            dimension_numbers=('NCH', 'OIH', 'NCH'), precision=hi)
        return out + b.reshape(1, -1, 1)

    def bn(y, g, b, eps=1e-5):
        mu = jnp.mean(y, axis=(0, 2), keepdims=True)
        var = jnp.mean((y - mu) ** 2, axis=(0, 2), keepdims=True)
        return (y - mu) / jnp.sqrt(var + eps) * g.reshape(1, -1, 1) + b.reshape(1, -1, 1)

    def leaky(y):
        return jnp.where(y >= 0, y, 0.1 * y)

    w1a = params['w1a'][:, :, None]                  # (Cout, Cin, 1)
    w1b = jnp.transpose(params['w1b'], (1, 2, 0))    # (Cout, Cout, 3)
    w2 = jnp.transpose(params['w2'], (1, 2, 0))      # (Cout, Cin, 3)

    y = leaky(bn(conv1d(x, w1a, params['b1a'][:, 0], 1, 0),
                 params['g1a'][:, 0], params['be1a'][:, 0]))
    z1 = leaky(bn(conv1d(y, w1b, params['b1b'][:, 0], 2, 1),
                  params['g1b'][:, 0], params['be1b'][:, 0]))
    z2 = leaky(conv1d(x, w2, params['b2'][:, 0], 2, 1))
    return z1 + z2


# --------------------------------------------------------------------------
# Deterministic parameter init + run.
# --------------------------------------------------------------------------
def init_params(key, cin, cout):
    ks = jax.random.split(key, 6)
    return {
        'w1a': jax.random.normal(ks[0], (cout, cin), jnp.float32) * 0.3,
        'b1a': jax.random.normal(ks[1], (cout, 1), jnp.float32) * 0.1,
        'g1a': jnp.ones((cout, 1), jnp.float32),
        'be1a': jnp.zeros((cout, 1), jnp.float32),
        'w1b': jax.random.normal(ks[2], (3, cout, cout), jnp.float32) * 0.2,
        'b1b': jax.random.normal(ks[3], (cout, 1), jnp.float32) * 0.1,
        'g1b': jnp.ones((cout, 1), jnp.float32),
        'be1b': jnp.zeros((cout, 1), jnp.float32),
        'w2': jax.random.normal(ks[4], (3, cout, cin), jnp.float32) * 0.2,
        'b2': jax.random.normal(ks[5], (cout, 1), jnp.float32) * 0.1,
    }
    # TODO(synk): BatchNorm running_mean/running_var updates (training-time
    # bookkeeping) are not materialized; only the forward output is.


if __name__ == "__main__":
    key = jax.random.PRNGKey(0)

    configs = [
        # (N, Cin, Cout, L, lane_tile)
        (2, 4, 8, 16, 512),    # single lane tile
        (4, 4, 8, 80, 128),    # nlo=160 -> 2 lane tiles, padded tail, stats accumulate
    ]
    for i, (N, C_IN, C_OUT, L, LT) in enumerate(configs):
        k_x, k_p = jax.random.split(jax.random.fold_in(key, i))
        x = jax.random.normal(k_x, (N, C_IN, L), jnp.float32)
        params = init_params(k_p, C_IN, C_OUT)

        fwd = jax.jit(functools.partial(resnet_ibn_forward, lane_tile=LT))
        out = jax.block_until_ready(fwd(x, params))
        ref = jax.block_until_ready(resnet_ibn_reference(x, params))

        assert out.shape == (N, C_OUT, L // 2), out.shape
        np.testing.assert_allclose(np.asarray(out), np.asarray(ref),
                                   rtol=5e-3, atol=5e-3)

    print("KERNEL_OK")
</pallas_src>

<mosaic_0001>
module attributes {stable_mosaic.version = 11 : i64} {
  func.func @_bn2_stats_kernel(%arg0: i32, %arg1: memref<4x128xf32, #tpu.memory_space<vmem>>, %arg2: memref<4x128xf32, #tpu.memory_space<vmem>>, %arg3: memref<4x128xf32, #tpu.memory_space<vmem>>, %arg4: memref<1x128xf32, #tpu.memory_space<vmem>>, %arg5: memref<8x4xf32, #tpu.memory_space<vmem>>, %arg6: memref<3x8x8xf32, #tpu.memory_space<vmem>>, %arg7: memref<2x8x1xf32, #tpu.memory_space<vmem>>, %arg8: memref<8x2xf32, #tpu.memory_space<vmem>>) attributes {dimension_semantics = [#tpu.dimension_semantics<arbitrary>], iteration_bounds = array<i64: 1>, scalar_prefetch = 0 : i64, scratch_operands = 0 : i64, tpu.core_type = #tpu.core_type<tc>, window_params = [{transform_indices = @transform_0, window_bounds = array<i64: 4, 128>}, {transform_indices = @transform_1, window_bounds = array<i64: 4, 128>}, {transform_indices = @transform_2, window_bounds = array<i64: 4, 128>}, {transform_indices = @transform_3, window_bounds = array<i64: 1, 128>}, {pipeline_mode = #tpu.pipeline_mode<synchronous>, transform_indices = @transform_4, window_bounds = array<i64: 8, 4>}, {pipeline_mode = #tpu.pipeline_mode<synchronous>, transform_indices = @transform_5, window_bounds = array<i64: 3, 8, 8>}, {pipeline_mode = #tpu.pipeline_mode<synchronous>, transform_indices = @transform_6, window_bounds = array<i64: 2, 8, 1>}, {pipeline_mode = #tpu.pipeline_mode<synchronous>, transform_indices = @transform_7, window_bounds = array<i64: 8, 2>}]} {
    %c0_i32 = arith.constant 0 : i32
    %0 = arith.cmpi eq, %arg0, %c0_i32 : i32
    %1 = arith.extui %0 : i1 to i32
    %c0_i32_0 = arith.constant 0 : i32
    %2 = arith.cmpi ne, %1, %c0_i32_0 : i32
    scf.if %2 {
      %cst_46 = arith.constant 0.000000e+00 : f32
      %80 = vector.broadcast %cst_46 : f32 to vector<8x2xf32>
      %c0_47 = arith.constant 0 : index
      %c0_48 = arith.constant 0 : index
      %81 = vector.load %arg8[%c0_47, %c0_48] : memref<8x2xf32, #tpu.memory_space<vmem>>, vector<8x2xf32>
      tpu.vector_store %arg8[%c0_47, %c0_48], %80 {strides = array<i32>} : memref<8x2xf32, #tpu.memory_space<vmem>>, vector<8x2xf32>,
    } else {
    }
    %c0 = arith.constant 0 : index
    %c0_1 = arith.constant 0 : index
    %3 = vector.load %arg5[%c0, %c0_1] : memref<8x4xf32, #tpu.memory_space<vmem>>, vector<8x4xf32>
    %c0_2 = arith.constant 0 : index
    %c0_3 = arith.constant 0 : index
    %c0_4 = arith.constant 0 : index
    %4 = vector.load %arg7[%c0_2, %c0_3, %c0_4] : memref<2x8x1xf32, #tpu.memory_space<vmem>>, vector<1x8x1xf32>
    %5 = vector.shape_cast %4 : vector<1x8x1xf32> to vector<8x1xf32>
    %c1 = arith.constant 1 : index
    %c0_5 = arith.constant 0 : index
    %c0_6 = arith.constant 0 : index
    %6 = vector.load %arg7[%c1, %c0_5, %c0_6] : memref<2x8x1xf32, #tpu.memory_space<vmem>>, vector<1x8x1xf32>
    %7 = vector.shape_cast %6 : vector<1x8x1xf32> to vector<8x1xf32>
    %c0_7 = arith.constant 0 : index
    %c0_8 = arith.constant 0 : index
    %c0_9 = arith.constant 0 : index
    %8 = vector.load %arg6[%c0_7, %c0_8, %c0_9] : memref<3x8x8xf32, #tpu.memory_space<vmem>>, vector<1x8x8xf32>
    %9 = vector.shape_cast %8 : vector<1x8x8xf32> to vector<8x8xf32>
    %c1_10 = arith.constant 1 : index
    %c0_11 = arith.constant 0 : index
    %c0_12 = arith.constant 0 : index
    %10 = vector.load %arg6[%c1_10, %c0_11, %c0_12] : memref<3x8x8xf32, #tpu.memory_space<vmem>>, vector<1x8x8xf32>
    %11 = vector.shape_cast %10 : vector<1x8x8xf32> to vector<8x8xf32>
    %c2 = arith.constant 2 : index
    %c0_13 = arith.constant 0 : index
    %c0_14 = arith.constant 0 : index
    %12 = vector.load %arg6[%c2, %c0_13, %c0_14] : memref<3x8x8xf32, #tpu.memory_space<vmem>>, vector<1x8x8xf32>
    %13 = vector.shape_cast %12 : vector<1x8x8xf32> to vector<8x8xf32>
    %c0_15 = arith.constant 0 : index
    %c0_16 = arith.constant 0 : index
    %14 = vector.load %arg1[%c0_15, %c0_16] : memref<4x128xf32, #tpu.memory_space<vmem>>, vector<4x128xf32>
    %cst = arith.constant dense<0.000000e+00> : vector<8x128xf32>
    %15 = tpu.matmul %3, %14, %cst {dimension_numbers = #tpu.dot_dimension_numbers<[1], [0], [0], [1], [0, 0, 1, 1], [], []>} : vector<8x4xf32>, vector<4x128xf32>, vector<8x128xf32> -> vector<8x128xf32>
    %16 = vector.broadcast %5 : vector<8x1xf32> to vector<8x128xf32>
    %17 = arith.mulf %15, %16 : vector<8x128xf32>
    %18 = vector.broadcast %7 : vector<8x1xf32> to vector<8x128xf32>
    %19 = arith.addf %17, %18 : vector<8x128xf32>
    %cst_17 = arith.constant 0.000000e+00 : f32
    %20 = vector.broadcast %cst_17 : f32 to vector<8x128xf32>
    %21 = arith.cmpf oge, %19, %20 : vector<8x128xf32>
    %cst_18 = arith.constant 1.000000e-01 : f32
    %22 = vector.broadcast %cst_18 : f32 to vector<8x128xf32>
    %23 = arith.mulf %22, %19 : vector<8x128xf32>
    %24 = arith.select %21, %19, %23 : vector<8x128xi1>, vector<8x128xf32>
    %c0_19 = arith.constant 0 : index
    %c0_20 = arith.constant 0 : index
    %25 = vector.load %arg2[%c0_19, %c0_20] : memref<4x128xf32, #tpu.memory_space<vmem>>, vector<4x128xf32>
    %cst_21 = arith.constant dense<0.000000e+00> : vector<8x128xf32>
    %26 = tpu.matmul %3, %25, %cst_21 {dimension_numbers = #tpu.dot_dimension_numbers<[1], [0], [0], [1], [0, 0, 1, 1], [], []>} : vector<8x4xf32>, vector<4x128xf32>, vector<8x128xf32> -> vector<8x128xf32>
    %27 = vector.broadcast %5 : vector<8x1xf32> to vector<8x128xf32>
    %28 = arith.mulf %26, %27 : vector<8x128xf32>
    %29 = vector.broadcast %7 : vector<8x1xf32> to vector<8x128xf32>
    %30 = arith.addf %28, %29 : vector<8x128xf32>
    %cst_22 = arith.constant 0.000000e+00 : f32
    %31 = vector.broadcast %cst_22 : f32 to vector<8x128xf32>
    %32 = arith.cmpf oge, %30, %31 : vector<8x128xf32>
    %cst_23 = arith.constant 1.000000e-01 : f32
    %33 = vector.broadcast %cst_23 : f32 to vector<8x128xf32>
    %34 = arith.mulf %33, %30 : vector<8x128xf32>
    %35 = arith.select %32, %30, %34 : vector<8x128xi1>, vector<8x128xf32>
    %c0_24 = arith.constant 0 : index
    %c0_25 = arith.constant 0 : index
    %36 = vector.load %arg3[%c0_24, %c0_25] : memref<4x128xf32, #tpu.memory_space<vmem>>, vector<4x128xf32>
    %cst_26 = arith.constant dense<0.000000e+00> : vector<8x128xf32>
    %37 = tpu.matmul %3, %36, %cst_26 {dimension_numbers = #tpu.dot_dimension_numbers<[1], [0], [0], [1], [0, 0, 1, 1], [], []>} : vector<8x4xf32>, vector<4x128xf32>, vector<8x128xf32> -> vector<8x128xf32>
    %38 = vector.broadcast %5 : vector<8x1xf32> to vector<8x128xf32>
    %39 = arith.mulf %37, %38 : vector<8x128xf32>
    %40 = vector.broadcast %7 : vector<8x1xf32> to vector<8x128xf32>
    %41 = arith.addf %39, %40 : vector<8x128xf32>
    %cst_27 = arith.constant 0.000000e+00 : f32
    %42 = vector.broadcast %cst_27 : f32 to vector<8x128xf32>
    %43 = arith.cmpf oge, %41, %42 : vector<8x128xf32>
    %cst_28 = arith.constant 1.000000e-01 : f32
    %44 = vector.broadcast %cst_28 : f32 to vector<8x128xf32>
    %45 = arith.mulf %44, %41 : vector<8x128xf32>
    %46 = arith.select %43, %41, %45 : vector<8x128xi1>, vector<8x128xf32>
    %c0_29 = arith.constant 0 : index
    %c0_30 = arith.constant 0 : index
    %47 = vector.load %arg4[%c0_29, %c0_30] : memref<1x128xf32, #tpu.memory_space<vmem>>, vector<1x128xf32>
    %48 = vector.broadcast %47 : vector<1x128xf32> to vector<8x128xf32>
    %49 = arith.mulf %46, %48 : vector<8x128xf32>
    %cst_31 = arith.constant dense<0.000000e+00> : vector<8x128xf32>
    %50 = tpu.matmul %11, %24, %cst_31 {dimension_numbers = #tpu.dot_dimension_numbers<[1], [0], [0], [1], [0, 0, 1, 1], [], []>} : vector<8x8xf32>, vector<8x128xf32>, vector<8x128xf32> -> vector<8x128xf32>
    %cst_32 = arith.constant dense<0.000000e+00> : vector<8x128xf32>
    %51 = tpu.matmul %13, %35, %cst_32 {dimension_numbers = #tpu.dot_dimension_numbers<[1], [0], [0], [1], [0, 0, 1, 1], [], []>} : vector<8x8xf32>, vector<8x128xf32>, vector<8x128xf32> -> vector<8x128xf32>
    %52 = arith.addf %50, %51 : vector<8x128xf32>
    %cst_33 = arith.constant dense<0.000000e+00> : vector<8x128xf32>
    %53 = tpu.matmul %9, %49, %cst_33 {dimension_numbers = #tpu.dot_dimension_numbers<[1], [0], [0], [1], [0, 0, 1, 1], [], []>} : vector<8x8xf32>, vector<8x128xf32>, vector<8x128xf32> -> vector<8x128xf32>
    %54 = arith.addf %52, %53 : vector<8x128xf32>
    %55 = tpu.iota {dimensions = array<i32: 1>} : vector<1x128xi32>
    %c128_i32 = arith.constant 128 : i32
    %56 = arith.muli %arg0, %c128_i32 : i32
    %57 = vector.broadcast %56 : i32 to vector<1x128xi32>
    %58 = arith.addi %55, %57 : vector<1x128xi32>
    %c16_i32 = arith.constant 16 : i32
    %59 = vector.broadcast %c16_i32 : i32 to vector<1x128xi32>
    %60 = arith.cmpi slt, %58, %59 : vector<1x128xi32>
    %cst_34 = arith.constant 0.000000e+00 : f32
    %61 = vector.shape_cast %60 : vector<1x128xi1> to vector<1x128xi1>
    %62 = vector.broadcast %61 : vector<1x128xi1> to vector<8x128xi1>
    %63 = vector.broadcast %cst_34 : f32 to vector<8x128xf32>
    %64 = arith.select %62, %54, %63 : vector<8x128xi1>, vector<8x128xf32>
    %65 = arith.mulf %54, %54 : vector<8x128xf32>
    %cst_35 = arith.constant 0.000000e+00 : f32
    %66 = vector.shape_cast %60 : vector<1x128xi1> to vector<1x128xi1>
    %67 = vector.broadcast %66 : vector<1x128xi1> to vector<8x128xi1>
    %68 = vector.broadcast %cst_35 : f32 to vector<8x128xf32>
    %69 = arith.select %67, %65, %68 : vector<8x128xi1>, vector<8x128xf32>
    %c0_36 = arith.constant 0 : index
    %c0_37 = arith.constant 0 : index
    %70 = vector.load %arg8[%c0_36, %c0_37] : memref<8x2xf32, #tpu.memory_space<vmem>>, vector<8x1xf32>
    %cst_38 = arith.constant dense<0.000000e+00> : vector<8xf32>
    %71 = vector.multi_reduction <add>, %64, %cst_38 [1] : vector<8x128xf32> to vector<8xf32>
    %72 = vector.shape_cast %71 : vector<8xf32> to vector<8x1xf32>
    %73 = arith.addf %70, %72 : vector<8x1xf32>
    %c0_39 = arith.constant 0 : index
    %c0_40 = arith.constant 0 : index
    %74 = vector.load %arg8[%c0_39, %c0_40] : memref<8x2xf32, #tpu.memory_space<vmem>>, vector<8x1xf32>
    tpu.vector_store %arg8[%c0_39, %c0_40], %73 {strides = array<i32>} : memref<8x2xf32, #tpu.memory_space<vmem>>, vector<8x1xf32>,
    %c0_41 = arith.constant 0 : index
    %c1_42 = arith.constant 1 : index
    %75 = vector.load %arg8[%c0_41, %c1_42] : memref<8x2xf32, #tpu.memory_space<vmem>>, vector<8x1xf32>
    %cst_43 = arith.constant dense<0.000000e+00> : vector<8xf32>
    %76 = vector.multi_reduction <add>, %69, %cst_43 [1] : vector<8x128xf32> to vector<8xf32>
    %77 = vector.shape_cast %76 : vector<8xf32> to vector<8x1xf32>
    %78 = arith.addf %75, %77 : vector<8x1xf32>
    %c0_44 = arith.constant 0 : index
    %c1_45 = arith.constant 1 : index
    %79 = vector.load %arg8[%c0_44, %c1_45] : memref<8x2xf32, #tpu.memory_space<vmem>>, vector<8x1xf32>
    tpu.vector_store %arg8[%c0_44, %c1_45], %78 {strides = array<i32>} : memref<8x2xf32, #tpu.memory_space<vmem>>, vector<8x1xf32>,
    return
  }
  func.func @transform_0(%arg0: i32) -> (i32, i32) {
    %c0_i32 = arith.constant 0 : i32
    %c0_i32_0 = arith.constant 0 : i32
    return %c0_i32, %arg0 : i32, i32
  }
  func.func @transform_1(%arg0: i32) -> (i32, i32) {
    %c0_i32 = arith.constant 0 : i32
    %c0_i32_0 = arith.constant 0 : i32
    return %c0_i32, %arg0 : i32, i32
  }
  func.func @transform_2(%arg0: i32) -> (i32, i32) {
    %c0_i32 = arith.constant 0 : i32
    %c0_i32_0 = arith.constant 0 : i32
    return %c0_i32, %arg0 : i32, i32
  }
  func.func @transform_3(%arg0: i32) -> (i32, i32) {
    %c0_i32 = arith.constant 0 : i32
    %c0_i32_0 = arith.constant 0 : i32
    return %c0_i32, %arg0 : i32, i32
  }
  func.func @transform_4(%arg0: i32) -> (i32, i32) {
    %c0_i32 = arith.constant 0 : i32
    %c0_i32_0 = arith.constant 0 : i32
    %c0_i32_1 = arith.constant 0 : i32
    return %c0_i32, %c0_i32_0 : i32, i32
  }
  func.func @transform_5(%arg0: i32) -> (i32, i32, i32) {
    %c0_i32 = arith.constant 0 : i32
    %c0_i32_0 = arith.constant 0 : i32
    %c0_i32_1 = arith.constant 0 : i32
    %c0_i32_2 = arith.constant 0 : i32
    return %c0_i32, %c0_i32_0, %c0_i32_1 : i32, i32, i32
  }
  func.func @transform_6(%arg0: i32) -> (i32, i32, i32) {
    %c0_i32 = arith.constant 0 : i32
    %c0_i32_0 = arith.constant 0 : i32
    %c0_i32_1 = arith.constant 0 : i32
    %c0_i32_2 = arith.constant 0 : i32
    return %c0_i32, %c0_i32_0, %c0_i32_1 : i32, i32, i32
  }
  func.func @transform_7(%arg0: i32) -> (i32, i32) {
    %c0_i32 = arith.constant 0 : i32
    %c0_i32_0 = arith.constant 0 : i32
    %c0_i32_1 = arith.constant 0 : i32
    return %c0_i32, %c0_i32_0 : i32, i32
  }
}

module attributes {stable_mosaic.version = 11 : i64} {
  func.func @_bn1_stats_kernel(%arg0: i32, %arg1: memref<4x128xf32, #tpu.memory_space<vmem>>, %arg2: memref<4x128xf32, #tpu.memory_space<vmem>>, %arg3: memref<8x4xf32, #tpu.memory_space<vmem>>, %arg4: memref<8x2xf32, #tpu.memory_space<vmem>>) attributes {dimension_semantics = [#tpu.dimension_semantics<arbitrary>], iteration_bounds = array<i64: 1>, scalar_prefetch = 0 : i64, scratch_operands = 0 : i64, tpu.core_type = #tpu.core_type<tc>, window_params = [{transform_indices = @transform_0, window_bounds = array<i64: 4, 128>}, {transform_indices = @transform_1, window_bounds = array<i64: 4, 128>}, {pipeline_mode = #tpu.pipeline_mode<synchronous>, transform_indices = @transform_2, window_bounds = array<i64: 8, 4>}, {pipeline_mode = #tpu.pipeline_mode<synchronous>, transform_indices = @transform_3, window_bounds = array<i64: 8, 2>}]} {
    %c0_i32 = arith.constant 0 : i32
    %0 = arith.cmpi eq, %arg0, %c0_i32 : i32
    %1 = arith.extui %0 : i1 to i32
    %c0_i32_0 = arith.constant 0 : i32
    %2 = arith.cmpi ne, %1, %c0_i32_0 : i32
    scf.if %2 {
      %cst_16 = arith.constant 0.000000e+00 : f32
      %22 = vector.broadcast %cst_16 : f32 to vector<8x2xf32>
      %c0_17 = arith.constant 0 : index
      %c0_18 = arith.constant 0 : index
      %23 = vector.load %arg4[%c0_17, %c0_18] : memref<8x2xf32, #tpu.memory_space<vmem>>, vector<8x2xf32>
      tpu.vector_store %arg4[%c0_17, %c0_18], %22 {strides = array<i32>} : memref<8x2xf32, #tpu.memory_space<vmem>>, vector<8x2xf32>,
    } else {
    }
    %c0 = arith.constant 0 : index
    %c0_1 = arith.constant 0 : index
    %3 = vector.load %arg3[%c0, %c0_1] : memref<8x4xf32, #tpu.memory_space<vmem>>, vector<8x4xf32>
    %c0_2 = arith.constant 0 : index
    %c0_3 = arith.constant 0 : index
    %4 = vector.load %arg1[%c0_2, %c0_3] : memref<4x128xf32, #tpu.memory_space<vmem>>, vector<4x128xf32>
    %cst = arith.constant dense<0.000000e+00> : vector<8x128xf32>
    %5 = tpu.matmul %3, %4, %cst {dimension_numbers = #tpu.dot_dimension_numbers<[1], [0], [0], [1], [0, 0, 1, 1], [], []>} : vector<8x4xf32>, vector<4x128xf32>, vector<8x128xf32> -> vector<8x128xf32>
    %c0_4 = arith.constant 0 : index
    %c0_5 = arith.constant 0 : index
    %6 = vector.load %arg2[%c0_4, %c0_5] : memref<4x128xf32, #tpu.memory_space<vmem>>, vector<4x128xf32>
    %cst_6 = arith.constant dense<0.000000e+00> : vector<8x128xf32>
    %7 = tpu.matmul %3, %6, %cst_6 {dimension_numbers = #tpu.dot_dimension_numbers<[1], [0], [0], [1], [0, 0, 1, 1], [], []>} : vector<8x4xf32>, vector<4x128xf32>, vector<8x128xf32> -> vector<8x128xf32>
    %c0_7 = arith.constant 0 : index
    %c0_8 = arith.constant 0 : index
    %8 = vector.load %arg4[%c0_7, %c0_8] : memref<8x2xf32, #tpu.memory_space<vmem>>, vector<8x1xf32>
    %9 = arith.addf %5, %7 : vector<8x128xf32>
    %cst_9 = arith.constant dense<0.000000e+00> : vector<8xf32>
    %10 = vector.multi_reduction <add>, %9, %cst_9 [1] : vector<8x128xf32> to vector<8xf32>
    %11 = vector.shape_cast %10 : vector<8xf32> to vector<8x1xf32>
    %12 = arith.addf %8, %11 : vector<8x1xf32>
    %c0_10 = arith.constant 0 : index
    %c0_11 = arith.constant 0 : index
    %13 = vector.load %arg4[%c0_10, %c0_11] : memref<8x2xf32, #tpu.memory_space<vmem>>, vector<8x1xf32>
    tpu.vector_store %arg4[%c0_10, %c0_11], %12 {strides = array<i32>} : memref<8x2xf32, #tpu.memory_space<vmem>>, vector<8x1xf32>,
    %c0_12 = arith.constant 0 : index
    %c1 = arith.constant 1 : index
    %14 = vector.load %arg4[%c0_12, %c1] : memref<8x2xf32, #tpu.memory_space<vmem>>, vector<8x1xf32>
    %15 = arith.mulf %5, %5 : vector<8x128xf32>
    %16 = arith.mulf %7, %7 : vector<8x128xf32>
    %17 = arith.addf %15, %16 : vector<8x128xf32>
    %cst_13 = arith.constant dense<0.000000e+00> : vector<8xf32>
    %18 = vector.multi_reduction <add>, %17, %cst_13 [1] : vector<8x128xf32> to vector<8xf32>
    %19 = vector.shape_cast %18 : vector<8xf32> to vector<8x1xf32>
    %20 = arith.addf %14, %19 : vector<8x1xf32>
    %c0_14 = arith.constant 0 : index
    %c1_15 = arith.constant 1 : index
    %21 = vector.load %arg4[%c0_14, %c1_15] : memref<8x2xf32, #tpu.memory_space<vmem>>, vector<8x1xf32>
    tpu.vector_store %arg4[%c0_14, %c1_15], %20 {strides = array<i32>} : memref<8x2xf32, #tpu.memory_space<vmem>>, vector<8x1xf32>,
    return
  }
  func.func @transform_0(%arg0: i32) -> (i32, i32) {
    %c0_i32 = arith.constant 0 : i32
    %c0_i32_0 = arith.constant 0 : i32
    return %c0_i32, %arg0 : i32, i32
  }
  func.func @transform_1(%arg0: i32) -> (i32, i32) {
    %c0_i32 = arith.constant 0 : i32
    %c0_i32_0 = arith.constant 0 : i32
    return %c0_i32, %arg0 : i32, i32
  }
  func.func @transform_2(%arg0: i32) -> (i32, i32) {
    %c0_i32 = arith.constant 0 : i32
    %c0_i32_0 = arith.constant 0 : i32
    %c0_i32_1 = arith.constant 0 : i32
    return %c0_i32, %c0_i32_0 : i32, i32
  }
  func.func @transform_3(%arg0: i32) -> (i32, i32) {
    %c0_i32 = arith.constant 0 : i32
    %c0_i32_0 = arith.constant 0 : i32
    %c0_i32_1 = arith.constant 0 : i32
    return %c0_i32, %c0_i32_0 : i32, i32
  }
}

module attributes {stable_mosaic.version = 11 : i64} {
  func.func @_apply_kernel(%arg0: i32, %arg1: memref<4x128xf32, #tpu.memory_space<vmem>>, %arg2: memref<4x128xf32, #tpu.memory_space<vmem>>, %arg3: memref<4x128xf32, #tpu.memory_space<vmem>>, %arg4: memref<1x128xf32, #tpu.memory_space<vmem>>, %arg5: memref<8x4xf32, #tpu.memory_space<vmem>>, %arg6: memref<3x8x8xf32, #tpu.memory_space<vmem>>, %arg7: memref<3x8x4xf32, #tpu.memory_space<vmem>>, %arg8: memref<5x8x1xf32, #tpu.memory_space<vmem>>, %arg9: memref<8x128xf32, #tpu.memory_space<vmem>>) attributes {dimension_semantics = [#tpu.dimension_semantics<parallel>], iteration_bounds = array<i64: 1>, scalar_prefetch = 0 : i64, scratch_operands = 0 : i64, tpu.core_type = #tpu.core_type<tc>, window_params = [{transform_indices = @transform_0, window_bounds = array<i64: 4, 128>}, {transform_indices = @transform_1, window_bounds = array<i64: 4, 128>}, {transform_indices = @transform_2, window_bounds = array<i64: 4, 128>}, {transform_indices = @transform_3, window_bounds = array<i64: 1, 128>}, {pipeline_mode = #tpu.pipeline_mode<synchronous>, transform_indices = @transform_4, window_bounds = array<i64: 8, 4>}, {pipeline_mode = #tpu.pipeline_mode<synchronous>, transform_indices = @transform_5, window_bounds = array<i64: 3, 8, 8>}, {pipeline_mode = #tpu.pipeline_mode<synchronous>, transform_indices = @transform_6, window_bounds = array<i64: 3, 8, 4>}, {pipeline_mode = #tpu.pipeline_mode<synchronous>, transform_indices = @transform_7, window_bounds = array<i64: 5, 8, 1>}, {transform_indices = @transform_8, window_bounds = array<i64: 8, 128>}]} {
    %c0 = arith.constant 0 : index
    %c0_0 = arith.constant 0 : index
    %0 = vector.load %arg5[%c0, %c0_0] : memref<8x4xf32, #tpu.memory_space<vmem>>, vector<8x4xf32>
    %c0_1 = arith.constant 0 : index
    %c0_2 = arith.constant 0 : index
    %c0_3 = arith.constant 0 : index
    %1 = vector.load %arg8[%c0_1, %c0_2, %c0_3] : memref<5x8x1xf32, #tpu.memory_space<vmem>>, vector<1x8x1xf32>
    %2 = vector.shape_cast %1 : vector<1x8x1xf32> to vector<8x1xf32>
    %c1 = arith.constant 1 : index
    %c0_4 = arith.constant 0 : index
    %c0_5 = arith.constant 0 : index
    %3 = vector.load %arg8[%c1, %c0_4, %c0_5] : memref<5x8x1xf32, #tpu.memory_space<vmem>>, vector<1x8x1xf32>
    %4 = vector.shape_cast %3 : vector<1x8x1xf32> to vector<8x1xf32>
    %c2 = arith.constant 2 : index
    %c0_6 = arith.constant 0 : index
    %c0_7 = arith.constant 0 : index
    %5 = vector.load %arg8[%c2, %c0_6, %c0_7] : memref<5x8x1xf32, #tpu.memory_space<vmem>>, vector<1x8x1xf32>
    %6 = vector.shape_cast %5 : vector<1x8x1xf32> to vector<8x1xf32>
    %c3 = arith.constant 3 : index
    %c0_8 = arith.constant 0 : index
    %c0_9 = arith.constant 0 : index
    %7 = vector.load %arg8[%c3, %c0_8, %c0_9] : memref<5x8x1xf32, #tpu.memory_space<vmem>>, vector<1x8x1xf32>
    %8 = vector.shape_cast %7 : vector<1x8x1xf32> to vector<8x1xf32>
    %c4 = arith.constant 4 : index
    %c0_10 = arith.constant 0 : index
    %c0_11 = arith.constant 0 : index
    %9 = vector.load %arg8[%c4, %c0_10, %c0_11] : memref<5x8x1xf32, #tpu.memory_space<vmem>>, vector<1x8x1xf32>
    %10 = vector.shape_cast %9 : vector<1x8x1xf32> to vector<8x1xf32>
    %c0_12 = arith.constant 0 : index
    %c0_13 = arith.constant 0 : index
    %c0_14 = arith.constant 0 : index
    %11 = vector.load %arg6[%c0_12, %c0_13, %c0_14] : memref<3x8x8xf32, #tpu.memory_space<vmem>>, vector<1x8x8xf32>
    %12 = vector.shape_cast %11 : vector<1x8x8xf32> to vector<8x8xf32>
    %c1_15 = arith.constant 1 : index
    %c0_16 = arith.constant 0 : index
    %c0_17 = arith.constant 0 : index
    %13 = vector.load %arg6[%c1_15, %c0_16, %c0_17] : memref<3x8x8xf32, #tpu.memory_space<vmem>>, vector<1x8x8xf32>
    %14 = vector.shape_cast %13 : vector<1x8x8xf32> to vector<8x8xf32>
    %c2_18 = arith.constant 2 : index
    %c0_19 = arith.constant 0 : index
    %c0_20 = arith.constant 0 : index
    %15 = vector.load %arg6[%c2_18, %c0_19, %c0_20] : memref<3x8x8xf32, #tpu.memory_space<vmem>>, vector<1x8x8xf32>
    %16 = vector.shape_cast %15 : vector<1x8x8xf32> to vector<8x8xf32>
    %c0_21 = arith.constant 0 : index
    %c0_22 = arith.constant 0 : index
    %c0_23 = arith.constant 0 : index
    %17 = vector.load %arg7[%c0_21, %c0_22, %c0_23] : memref<3x8x4xf32, #tpu.memory_space<vmem>>, vector<1x8x4xf32>
    %18 = vector.shape_cast %17 : vector<1x8x4xf32> to vector<8x4xf32>
    %c1_24 = arith.constant 1 : index
    %c0_25 = arith.constant 0 : index
    %c0_26 = arith.constant 0 : index
    %19 = vector.load %arg7[%c1_24, %c0_25, %c0_26] : memref<3x8x4xf32, #tpu.memory_space<vmem>>, vector<1x8x4xf32>
    %20 = vector.shape_cast %19 : vector<1x8x4xf32> to vector<8x4xf32>
    %c2_27 = arith.constant 2 : index
    %c0_28 = arith.constant 0 : index
    %c0_29 = arith.constant 0 : index
    %21 = vector.load %arg7[%c2_27, %c0_28, %c0_29] : memref<3x8x4xf32, #tpu.memory_space<vmem>>, vector<1x8x4xf32>
    %22 = vector.shape_cast %21 : vector<1x8x4xf32> to vector<8x4xf32>
    %c0_30 = arith.constant 0 : index
    %c0_31 = arith.constant 0 : index
    %23 = vector.load %arg1[%c0_30, %c0_31] : memref<4x128xf32, #tpu.memory_space<vmem>>, vector<4x128xf32>
    %c0_32 = arith.constant 0 : index
    %c0_33 = arith.constant 0 : index
    %24 = vector.load %arg2[%c0_32, %c0_33] : memref<4x128xf32, #tpu.memory_space<vmem>>, vector<4x128xf32>
    %c0_34 = arith.constant 0 : index
    %c0_35 = arith.constant 0 : index
    %25 = vector.load %arg3[%c0_34, %c0_35] : memref<4x128xf32, #tpu.memory_space<vmem>>, vector<4x128xf32>
    %c0_36 = arith.constant 0 : index
    %c0_37 = arith.constant 0 : index
    %26 = vector.load %arg4[%c0_36, %c0_37] : memref<1x128xf32, #tpu.memory_space<vmem>>, vector<1x128xf32>
    %cst = arith.constant dense<0.000000e+00> : vector<8x128xf32>
    %27 = tpu.matmul %0, %23, %cst {dimension_numbers = #tpu.dot_dimension_numbers<[1], [0], [0], [1], [0, 0, 1, 1], [], []>} : vector<8x4xf32>, vector<4x128xf32>, vector<8x128xf32> -> vector<8x128xf32>
    %28 = vector.broadcast %2 : vector<8x1xf32> to vector<8x128xf32>
    %29 = arith.mulf %27, %28 : vector<8x128xf32>
    %30 = vector.broadcast %4 : vector<8x1xf32> to vector<8x128xf32>
    %31 = arith.addf %29, %30 : vector<8x128xf32>
    %cst_38 = arith.constant 0.000000e+00 : f32
    %32 = vector.broadcast %cst_38 : f32 to vector<8x128xf32>
    %33 = arith.cmpf oge, %31, %32 : vector<8x128xf32>
    %cst_39 = arith.constant 1.000000e-01 : f32
    %34 = vector.broadcast %cst_39 : f32 to vector<8x128xf32>
    %35 = arith.mulf %34, %31 : vector<8x128xf32>
    %36 = arith.select %33, %31, %35 : vector<8x128xi1>, vector<8x128xf32>
    %cst_40 = arith.constant dense<0.000000e+00> : vector<8x128xf32>
    %37 = tpu.matmul %0, %24, %cst_40 {dimension_numbers = #tpu.dot_dimension_numbers<[1], [0], [0], [1], [0, 0, 1, 1], [], []>} : vector<8x4xf32>, vector<4x128xf32>, vector<8x128xf32> -> vector<8x128xf32>
    %38 = vector.broadcast %2 : vector<8x1xf32> to vector<8x128xf32>
    %39 = arith.mulf %37, %38 : vector<8x128xf32>
    %40 = vector.broadcast %4 : vector<8x1xf32> to vector<8x128xf32>
    %41 = arith.addf %39, %40 : vector<8x128xf32>
    %cst_41 = arith.constant 0.000000e+00 : f32
    %42 = vector.broadcast %cst_41 : f32 to vector<8x128xf32>
    %43 = arith.cmpf oge, %41, %42 : vector<8x128xf32>
    %cst_42 = arith.constant 1.000000e-01 : f32
    %44 = vector.broadcast %cst_42 : f32 to vector<8x128xf32>
    %45 = arith.mulf %44, %41 : vector<8x128xf32>
    %46 = arith.select %43, %41, %45 : vector<8x128xi1>, vector<8x128xf32>
    %cst_43 = arith.constant dense<0.000000e+00> : vector<8x128xf32>
    %47 = tpu.matmul %0, %25, %cst_43 {dimension_numbers = #tpu.dot_dimension_numbers<[1], [0], [0], [1], [0, 0, 1, 1], [], []>} : vector<8x4xf32>, vector<4x128xf32>, vector<8x128xf32> -> vector<8x128xf32>
    %48 = vector.broadcast %2 : vector<8x1xf32> to vector<8x128xf32>
    %49 = arith.mulf %47, %48 : vector<8x128xf32>
    %50 = vector.broadcast %4 : vector<8x1xf32> to vector<8x128xf32>
    %51 = arith.addf %49, %50 : vector<8x128xf32>
    %cst_44 = arith.constant 0.000000e+00 : f32
    %52 = vector.broadcast %cst_44 : f32 to vector<8x128xf32>
    %53 = arith.cmpf oge, %51, %52 : vector<8x128xf32>
    %cst_45 = arith.constant 1.000000e-01 : f32
    %54 = vector.broadcast %cst_45 : f32 to vector<8x128xf32>
    %55 = arith.mulf %54, %51 : vector<8x128xf32>
    %56 = arith.select %53, %51, %55 : vector<8x128xi1>, vector<8x128xf32>
    %57 = vector.broadcast %26 : vector<1x128xf32> to vector<8x128xf32>
    %58 = arith.mulf %56, %57 : vector<8x128xf32>
    %cst_46 = arith.constant dense<0.000000e+00> : vector<8x128xf32>
    %59 = tpu.matmul %14, %36, %cst_46 {dimension_numbers = #tpu.dot_dimension_numbers<[1], [0], [0], [1], [0, 0, 1, 1], [], []>} : vector<8x8xf32>, vector<8x128xf32>, vector<8x128xf32> -> vector<8x128xf32>
    %cst_47 = arith.constant dense<0.000000e+00> : vector<8x128xf32>
    %60 = tpu.matmul %16, %46, %cst_47 {dimension_numbers = #tpu.dot_dimension_numbers<[1], [0], [0], [1], [0, 0, 1, 1], [], []>} : vector<8x8xf32>, vector<8x128xf32>, vector<8x128xf32> -> vector<8x128xf32>
    %61 = arith.addf %59, %60 : vector<8x128xf32>
    %cst_48 = arith.constant dense<0.000000e+00> : vector<8x128xf32>
    %62 = tpu.matmul %12, %58, %cst_48 {dimension_numbers = #tpu.dot_dimension_numbers<[1], [0], [0], [1], [0, 0, 1, 1], [], []>} : vector<8x8xf32>, vector<8x128xf32>, vector<8x128xf32> -> vector<8x128xf32>
    %63 = arith.addf %61, %62 : vector<8x128xf32>
    %64 = vector.broadcast %6 : vector<8x1xf32> to vector<8x128xf32>
    %65 = arith.mulf %63, %64 : vector<8x128xf32>
    %66 = vector.broadcast %8 : vector<8x1xf32> to vector<8x128xf32>
    %67 = arith.addf %65, %66 : vector<8x128xf32>
    %cst_49 = arith.constant 0.000000e+00 : f32
    %68 = vector.broadcast %cst_49 : f32 to vector<8x128xf32>
    %69 = arith.cmpf oge, %67, %68 : vector<8x128xf32>
    %cst_50 = arith.constant 1.000000e-01 : f32
    %70 = vector.broadcast %cst_50 : f32 to vector<8x128xf32>
    %71 = arith.mulf %70, %67 : vector<8x128xf32>
    %72 = arith.select %69, %67, %71 : vector<8x128xi1>, vector<8x128xf32>
    %cst_51 = arith.constant dense<0.000000e+00> : vector<8x128xf32>
    %73 = tpu.matmul %20, %23, %cst_51 {dimension_numbers = #tpu.dot_dimension_numbers<[1], [0], [0], [1], [0, 0, 1, 1], [], []>} : vector<8x4xf32>, vector<4x128xf32>, vector<8x128xf32> -> vector<8x128xf32>
    %cst_52 = arith.constant dense<0.000000e+00> : vector<8x128xf32>
    %74 = tpu.matmul %22, %24, %cst_52 {dimension_numbers = #tpu.dot_dimension_numbers<[1], [0], [0], [1], [0, 0, 1, 1], [], []>} : vector<8x4xf32>, vector<4x128xf32>, vector<8x128xf32> -> vector<8x128xf32>
    %75 = arith.addf %73, %74 : vector<8x128xf32>
    %cst_53 = arith.constant dense<0.000000e+00> : vector<8x128xf32>
    %76 = tpu.matmul %18, %25, %cst_53 {dimension_numbers = #tpu.dot_dimension_numbers<[1], [0], [0], [1], [0, 0, 1, 1], [], []>} : vector<8x4xf32>, vector<4x128xf32>, vector<8x128xf32> -> vector<8x128xf32>
    %77 = arith.addf %75, %76 : vector<8x128xf32>
    %78 = vector.broadcast %10 : vector<8x1xf32> to vector<8x128xf32>
    %79 = arith.addf %77, %78 : vector<8x128xf32>
    %cst_54 = arith.constant 0.000000e+00 : f32
    %80 = vector.broadcast %cst_54 : f32 to vector<8x128xf32>
    %81 = arith.cmpf oge, %79, %80 : vector<8x128xf32>
    %cst_55 = arith.constant 1.000000e-01 : f32
    %82 = vector.broadcast %cst_55 : f32 to vector<8x128xf32>
    %83 = arith.mulf %82, %79 : vector<8x128xf32>
    %84 = arith.select %81, %79, %83 : vector<8x128xi1>, vector<8x128xf32>
    %85 = arith.addf %72, %84 : vector<8x128xf32>
    %c0_56 = arith.constant 0 : index
    %c0_57 = arith.constant 0 : index
    %86 = vector.load %arg9[%c0_56, %c0_57] : memref<8x128xf32, #tpu.memory_space<vmem>>, vector<8x128xf32>
    tpu.vector_store %arg9[%c0_56, %c0_57], %85 {strides = array<i32>} : memref<8x128xf32, #tpu.memory_space<vmem>>, vector<8x128xf32>,
    return
  }
  func.func @transform_0(%arg0: i32) -> (i32, i32) {
    %c0_i32 = arith.constant 0 : i32
    %c0_i32_0 = arith.constant 0 : i32
    return %c0_i32, %arg0 : i32, i32
  }
  func.func @transform_1(%arg0: i32) -> (i32, i32) {
    %c0_i32 = arith.constant 0 : i32
    %c0_i32_0 = arith.constant 0 : i32
    return %c0_i32, %arg0 : i32, i32
  }
  func.func @transform_2(%arg0: i32) -> (i32, i32) {
    %c0_i32 = arith.constant 0 : i32
    %c0_i32_0 = arith.constant 0 : i32
    return %c0_i32, %arg0 : i32, i32
  }
  func.func @transform_3(%arg0: i32) -> (i32, i32) {
    %c0_i32 = arith.constant 0 : i32
    %c0_i32_0 = arith.constant 0 : i32
    return %c0_i32, %arg0 : i32, i32
  }
  func.func @transform_4(%arg0: i32) -> (i32, i32) {
    %c0_i32 = arith.constant 0 : i32
    %c0_i32_0 = arith.constant 0 : i32
    %c0_i32_1 = arith.constant 0 : i32
    return %c0_i32, %c0_i32_0 : i32, i32
  }
  func.func @transform_5(%arg0: i32) -> (i32, i32, i32) {
    %c0_i32 = arith.constant 0 : i32
    %c0_i32_0 = arith.constant 0 : i32
    %c0_i32_1 = arith.constant 0 : i32
    %c0_i32_2 = arith.constant 0 : i32
    return %c0_i32, %c0_i32_0, %c0_i32_1 : i32, i32, i32
  }
  func.func @transform_6(%arg0: i32) -> (i32, i32, i32) {
    %c0_i32 = arith.constant 0 : i32
    %c0_i32_0 = arith.constant 0 : i32
    %c0_i32_1 = arith.constant 0 : i32
    %c0_i32_2 = arith.constant 0 : i32
    return %c0_i32, %c0_i32_0, %c0_i32_1 : i32, i32, i32
  }
  func.func @transform_7(%arg0: i32) -> (i32, i32, i32) {
    %c0_i32 = arith.constant 0 : i32
    %c0_i32_0 = arith.constant 0 : i32
    %c0_i32_1 = arith.constant 0 : i32
    %c0_i32_2 = arith.constant 0 : i32
    return %c0_i32, %c0_i32_0, %c0_i32_1 : i32, i32, i32
  }
  func.func @transform_8(%arg0: i32) -> (i32, i32) {
    %c0_i32 = arith.constant 0 : i32
    %c0_i32_0 = arith.constant 0 : i32
    return %c0_i32, %arg0 : i32, i32
  }
}

</mosaic_0001>

<bundles_post_ra>
// kernel: resnet_ibn_forward.3
= control target key start
LH: loop header
LB: loop body
LE: loop exit
PB: predicated region body
PF: predicated region fallthrough
CT: control target
= control target key end

     0   :  { %vm26_vm0 = vcmask 1043456   ;;  %v214_v0 = vmov 0.0   ;;  %vm22_vm1 = vcmask 31744   ;;  %vm215_vm2 = vmmov 0   ;;  %s260_s0 = inlined_call_operand.vmem [shape: f32[4,128], index: 0, kind: input, shape index: {}]   ;;  %s261_s1 = inlined_call_operand.vmem [shape: f32[4,128], index: 1, kind: input, shape index: {}]   ;;  %s262_s2 = inlined_call_operand.vmem [shape: f32[8,4], index: 2, kind: input, shape index: {}]   ;;  %s263_s3 = inlined_call_operand.vmem [shape: f32[8,2], index: 3, kind: output, shape index: {}]  }
   0x1   :  { %202 = vmatprep.subr.mxu0 %v214_v0  ;;  %207 = vmatprep.subr.mxu1 %v214_v0  ;;  %v21_v1 = vld [vmem:[%s260_s0] sm:$0xf]  ;;  %vm18_vm3 = vcmask 15360   ;;  %vm179_vm4 = vcmask 7168   ;;  %vm188_vm5 = vcmask 15368  }
   0x2   :  { %v100_v2 = vld [vmem:[%s261_s1] sm:$0xf]  ;;  %203 = vmatpush3.msk.msra.mxu0 %vm26_vm0, %v21_v1  ;;  %204 = vmatprep.mubr.msk.f32.mxu0 %vm215_vm2, %v214_v0  ;;  %19 = vst.msk [vmem:[%s263_s3] sm:$0xff] %vm18_vm3, %v214_v0 }
   0x3   :  { %v20_v3 = vld [vmem:[%s262_s2] sm:$0xff]  ;;  %208 = vmatpush3.msk.msra.mxu1 %vm26_vm0, %v100_v2  ;;  %209 = vmatprep.mubr.msk.f32.mxu1 %vm215_vm2, %v214_v0 }
   0x4   :  { %205 = vmatmul.mubr.msk.f32.vlgmr.msra.gmra.mrb[0].mxu0 %vm22_vm1, %v20_v3  ;;  %210 = vmatmul.mubr.msk.f32.vlgmr.msra.gmra.mrb[0].mxu1 %vm22_vm1, %v20_v3 }
   0x9   :  { %v174_v12 = vld [vmem:[%s263_s3] sm:$0xff] }
  0xd7   :  { %v96_v4 = vpop.f32.mrb[0].mxu0  ;;  %v170_v5 = vpop.f32.mrb[0].mxu1 }
  0xd8   :  { %v182_v6 = vmul.f32 %v96_v4, %v96_v4  ;;  %v183_v7 = vmul.f32 %v170_v5, %v170_v5  ;;  %v206_v8 = vpop.f32.mrb[1].mxu0  ;;  %v211_v9 = vpop.f32.mrb[1].mxu1  ;;  %v175_v10 = vadd.f32 %v170_v5, %v96_v4 }
  0xda   :  { %176 = vadd.xlane.f32.xlu0 %v175_v10  ;;  %v184_v11 = vadd.f32 %v183_v7, %v182_v6 }
  0xde   :  { %185 = vadd.xlane.f32.xlu0 %v184_v11 }
 0x167   :  { %v177_v13 = vpop.xlane.xlu0 %176 }
 0x168   :  { %v178_v14 = vadd.f32 %v177_v13, %v174_v12 }
 0x16a   :  { %180 = vst.msk [vmem:[%s263_s3] sm:$0xff] %vm179_vm4, %v178_v14 }
 0x16b   :  { %v186_v16 = vpop.xlane.xlu0 %185 }
 0x171   :  { %v181_v15 = vld [vmem:[%s263_s3] sm:$0xff] }
 0x172   :  { %v187_v17 = vadd.f32 %v186_v16, %v181_v15 }
 0x174   :  { %189 = vst.msk [vmem:[%s263_s3] sm:$0xff] %vm188_vm5, %v187_v17 }

// kernel: resnet_ibn_forward.4
= control target key start
LH: loop header
LB: loop body
LE: loop exit
PB: predicated region body
PF: predicated region fallthrough
CT: control target
= control target key end

     0   :  { %vm46_vm0 = vcmask 1043456   ;;  %vm42_vm1 = vcmask 31744   ;;  %v612_v0 = vmov 0.0   ;;  %vm613_vm2 = vmmov 0   ;;  %s728_s0 = inlined_call_operand.vmem [shape: f32[4,128], index: 0, kind: input, shape index: {}]   ;;  %s729_s4 = inlined_call_operand.vmem [shape: f32[8,4], index: 4, kind: input, shape index: {}]   ;;  %s730_s1 = inlined_call_operand.vmem [shape: f32[4,128], index: 1, kind: input, shape index: {}]   ;;  %s731_s6 = inlined_call_operand.vmem [shape: f32[2,8,1], index: 6, kind: input, shape index: {}]   ;;  %s732_s2 = inlined_call_operand.vmem [shape: f32[4,128], index: 2, kind: input, shape index: {}]   ;;  %s733_s5 = inlined_call_operand.vmem [shape: f32[3,8,8], index: 5, kind: input, shape index: {}]   ;;  %s734_s3 = inlined_call_operand.vmem [shape: f32[1,128], index: 3, kind: input, shape index: {}]   ;;  %s735_s7 = inlined_call_operand.vmem [shape: f32[8,2], index: 7, kind: output, shape index: {}]  }
   0x1   :  { %574 = vmatprep.subr.mxu0 %v612_v0  ;;  %v41_v1 = vld [vmem:[%s728_s0] sm:$0xf]  ;;  %576 = vmatprep.mubr.msk.f32.mxu0 %vm613_vm2, %v612_v0  ;;  %v614_v4 = vmov 0   ;;  %v549_v7 = vld [vmem:[%s731_s6 + $0x8] sm:$0xff]  ;;  %v551_v23 = vld [vmem:[%s733_s5 + $0x10] sm:$0xff]  ;;  %vm301_vm4 = vcmask 64512   ;;  %v522_v33 = vlaneseq }
   0x2   :  { %v32_v2 = vld [vmem:[%s729_s4] sm:$0xff]  ;;  %575 = vmatpush3.msk.msra.mxu0 %vm46_vm0, %v41_v1  ;;  %611 = vset.pattern.permute.xlu0 %v614_v4  ;;  %v550_v30 = vld [vmem:[%s733_s5 + $0x8] sm:$0xff]  ;;  %vm30_vm7 = vcmask 15360   ;;  %vm537_vm9 = vcmask 7168   ;;  %vm543_vm10 = vcmask 15368  }
   0x3   :  { %v135_v3 = vld [vmem:[%s730_s1] sm:$0xf]  ;;  %577 = vmatmul.mubr.msk.f32.vlgmr.msra.gmra.mrb[0].mxu0 %vm42_vm1, %v32_v2  ;;  %579 = vmatprep.subr.mxu0 %v612_v0  ;;  %31 = vst.msk [vmem:[%s735_s7] sm:$0xff] %vm30_vm7, %v612_v0  ;;  %v523_v34 = vand.u32 127, %v522_v33 }
   0x4   :  { %v33_v5 = vld [vmem:[%s731_s6] sm:$0xff]  ;;  %580 = vmatpush3.msk.msra.mxu0 %vm46_vm0, %v135_v3  ;;  %581 = vmatprep.mubr.msk.f32.mxu0 %vm613_vm2, %v612_v0 }
   0x5   :  { %584 = vmatprep.subr.mxu0 %v612_v0  ;;  %v214_v6 = vld [vmem:[%s732_s2] sm:$0xf]  ;;  %122 = vperm.xlu0 %611, %v33_v5   ;;  %vm527_vm8 = vcmp.lt.s32.totalorder %v523_v34, 16 }
   0x6   :  { %589 = vmatprep.subr.mxu1 %v612_v0  ;;  %591 = vmatprep.mubr.msk.f32.mxu1 %vm613_vm2, %v612_v0  ;;  %v558_v29 = vld [vmem:[%s734_s3] ss:$0 sm:$0xff] }
   0x7   :  { %582 = vmatmul.mubr.msk.f32.vlgmr.msra.gmra.mrb[2].mxu0 %vm42_vm1, %v32_v2  ;;  %v36_v32 = vld [vmem:[%s733_s5] sm:$0xff] }
   0x8   :  { %585 = vmatpush3.msk.msra.mxu0 %vm46_vm0, %v214_v6  ;;  %586 = vmatprep.mubr.msk.f32.mxu0 %vm613_vm2, %v612_v0 }
   0x9   :  { %128 = vperm.xlu0 %611, %v549_v7  }
   0xa   :  { %v533_v40 = vld [vmem:[%s735_s7] sm:$0xff] }
   0xb   :  { %587 = vmatmul.mubr.msk.f32.vlgmr.msra.gmra.mrb[4].mxu0 %vm42_vm1, %v32_v2 }
  0x84   :  { %v123_v8 = vpop.permute.xlu0 %122 }
  0x88   :  { %v129_v12 = vpop.permute.xlu0 %128 }
  0xd6   :  { %v116_v9 = vpop.f32.mrb[0].mxu0 }
  0xd7   :  { %v125_v10 = vmul.f32 %v123_v8, %v116_v9  ;;  %v578_v11 = vpop.f32.mrb[1].mxu0 }
  0xd9   :  { %v131_v14 = vadd.f32 %v129_v12, %v125_v10 }
  0xda   :  { %v205_v13 = vpop.f32.mrb[2].mxu0 }
  0xdb   :  { %v209_v15 = vmul.f32 %v205_v13, %v123_v8  ;;  %v583_v16 = vpop.f32.mrb[3].mxu0  ;;  %v133_v19 = vmul.f32 0.1, %v131_v14  ;;  %vm132_vm5 = vcmp.ge.f32.partialorder %v131_v14, 0.0 }
  0xdd   :  { %v210_v17 = vadd.f32 %v209_v15, %v129_v12  ;;  %v134_v27 = vsel %vm132_vm5, %v131_v14, %v133_v19 }
  0xde   :  { %v284_v18 = vpop.f32.mrb[4].mxu0 }
  0xdf   :  { %v288_v20 = vmul.f32 %v284_v18, %v123_v8  ;;  %v588_v21 = vpop.f32.mrb[5].mxu0  ;;  %vm211_vm3 = vcmp.ge.f32.partialorder %v210_v17, 0.0  ;;  %v212_v22 = vmul.f32 0.1, %v210_v17 }
  0xe1   :  { %v289_v24 = vadd.f32 %v288_v20, %v129_v12  ;;  %v213_v25 = vsel %vm211_vm3, %v210_v17, %v212_v22 }
  0xe2   :  { %590 = vmatpush3.msra.mxu1 %v213_v25 }
  0xe3   :  { %v291_v26 = vmul.f32 0.1, %v289_v24  ;;  %592 = vmatmul.mubr.msk.f32.vlgmr.msra.gmra.mrb[0].mxu1 %vm301_vm4, %v551_v23  ;;  %594 = vmatprep.subr.mxu1 %v612_v0  ;;  %vm290_vm6 = vcmp.ge.f32.partialorder %v289_v24, 0.0 }
  0xe4   :  { %595 = vmatpush3.msra.mxu1 %v134_v27  ;;  %596 = vmatprep.mubr.msk.f32.mxu1 %vm613_vm2, %v612_v0 }
  0xe5   :  { %599 = vmatprep.subr.mxu1 %v612_v0  ;;  %v292_v28 = vsel %vm290_vm6, %v289_v24, %v291_v26 }
  0xe6   :  { %v300_v31 = vmul.f32 %v558_v29, %v292_v28 }
  0xeb   :  { %597 = vmatmul.mubr.msk.f32.vlgmr.msra.gmra.mrb[0].mxu1 %vm301_vm4, %v550_v30 }
  0xec   :  { %600 = vmatpush3.msra.mxu1 %v300_v31  ;;  %601 = vmatprep.mubr.msk.f32.mxu1 %vm613_vm2, %v612_v0 }
  0xf3   :  { %602 = vmatmul.mubr.msk.f32.vlgmr.msra.gmra.mrb[0].mxu1 %vm301_vm4, %v36_v32 }
 0x1c6   :  { %v517_v35 = vpop.f32.mrb[0].mxu1 }
 0x1c7   :  { %v531_v36 = vmul.f32 %v517_v35, %v517_v35  ;;  %v603_v37 = vpop.f32.mrb[1].mxu1  ;;  %v530_v38 = vsel %vm527_vm8, %v517_v35, 0.0 }
 0x1c8   :  { %534 = vadd.xlane.f32.xlu1 %v530_v38 }
 0x1c9   :  { %v532_v39 = vsel %vm527_vm8, %v531_v36, 0.0 }
 0x1cc   :  { %540 = vadd.xlane.f32.xlu1 %v532_v39 }
 0x255   :  { %v535_v41 = vpop.xlane.xlu1 %534 }
 0x256   :  { %v536_v42 = vadd.f32 %v535_v41, %v533_v40 }
 0x258   :  { %538 = vst.msk [vmem:[%s735_s7] sm:$0xff] %vm537_vm9, %v536_v42 }
 0x259   :  { %v541_v44 = vpop.xlane.xlu1 %540 }
 0x25f   :  { %v539_v43 = vld [vmem:[%s735_s7] sm:$0xff] }
 0x260   :  { %v542_v45 = vadd.f32 %v541_v44, %v539_v43 }
 0x262   :  { %544 = vst.msk [vmem:[%s735_s7] sm:$0xff] %vm543_vm10, %v542_v45 }

// kernel: resnet_ibn_forward.5
= control target key start
LH: loop header
LB: loop body
LE: loop exit
PB: predicated region body
PF: predicated region fallthrough
CT: control target
= control target key end

     0   :  { %vm57_vm0 = vcmask 1043456   ;;  %v876_v0 = vmov 0.0   ;;  %vm53_vm1 = vcmask 31744   ;;  %vm877_vm2 = vmmov 0   ;;  %s1017_s0 = inlined_call_operand.vmem [shape: f32[4,128], index: 0, kind: input, shape index: {}]   ;;  %s1018_s1 = inlined_call_operand.vmem [shape: f32[4,128], index: 1, kind: input, shape index: {}]   ;;  %s1019_s4 = inlined_call_operand.vmem [shape: f32[8,4], index: 4, kind: input, shape index: {}]   ;;  %s1020_s2 = inlined_call_operand.vmem [shape: f32[4,128], index: 2, kind: input, shape index: {}]   ;;  %s1021_s7 = inlined_call_operand.vmem [shape: f32[5,8,1], index: 7, kind: input, shape index: {}]   ;;  %s1022_s6 = inlined_call_operand.vmem [shape: f32[3,8,4], index: 6, kind: input, shape index: {}]   ;;  %s1023_s5 = inlined_call_operand.vmem [shape: f32[3,8,8], index: 5, kind: input, shape index: {}]   ;;  %s1024_s3 = inlined_call_operand.vmem [shape: f32[1,128], index: 3, kind: input, shape index: {}]   ;;  %s1025_s8 = inlined_call_operand.vmem [shape: f32[8,128], index: 8, kind: output, shape index: {}]  }
   0x1   :  { %822 = vmatprep.subr.mxu0 %v876_v0  ;;  %827 = vmatprep.subr.mxu1 %v876_v0  ;;  %v49_v1 = vld [vmem:[%s1017_s0] sm:$0xf]  ;;  %v878_v6 = vmov 0   ;;  %v780_v7 = vld [vmem:[%s1021_s7 + $0x8] sm:$0xff]  ;;  %v787_v8 = vld [vmem:[%s1022_s6 + $0x10] sm:$0xff]  ;;  %vm309_vm4 = vcmask 64512  }
   0x2   :  { %v50_v2 = vld [vmem:[%s1018_s1] sm:$0xf]  ;;  %823 = vmatpush3.msk.msra.mxu0 %vm57_vm0, %v49_v1  ;;  %824 = vmatprep.mubr.msk.f32.mxu0 %vm877_vm2, %v876_v0  ;;  %v786_v10 = vld [vmem:[%s1022_s6 + $0x8] sm:$0xff]  ;;  %v781_v12 = vld [vmem:[%s1021_s7 + $0x10] sm:$0xff] }
   0x3   :  { %v29_v3 = vld [vmem:[%s1019_s4] sm:$0xff]  ;;  %828 = vmatpush3.msk.msra.mxu1 %vm57_vm0, %v50_v2  ;;  %829 = vmatprep.mubr.msk.f32.mxu1 %vm877_vm2, %v876_v0  ;;  %v782_v13 = vld [vmem:[%s1021_s7 + $0x18] sm:$0xff]  ;;  %v785_v29 = vld [vmem:[%s1023_s5 + $0x10] sm:$0xff] }
   0x4   :  { %v51_v4 = vld [vmem:[%s1020_s2] sm:$0xf]  ;;  %825 = vmatmul.mubr.msk.f32.vlgmr.msra.gmra.mrb[0].mxu0 %vm53_vm1, %v29_v3  ;;  %830 = vmatmul.mubr.msk.f32.vlgmr.msra.gmra.mrb[0].mxu1 %vm53_vm1, %v29_v3  ;;  %v784_v41 = vld [vmem:[%s1023_s5 + $0x8] sm:$0xff] }
   0x5   :  { %v30_v5 = vld [vmem:[%s1021_s7] sm:$0xff]  ;;  %832 = vmatprep.subr.mxu0 %v876_v0  ;;  %834 = vmatprep.mubr.msk.f32.mxu0 %vm877_vm2, %v876_v0 }
   0x6   :  { %833 = vmatpush3.msk.msra.mxu0 %vm57_vm0, %v51_v4  ;;  %874 = vset.pattern.permute.xlu0 %v878_v6  ;;  %v783_v9 = vld [vmem:[%s1021_s7 + $0x20] sm:$0xff] }
   0x7   :  { %852 = vmatprep.subr.mxu0 %v876_v0  ;;  %133 = vperm.xlu0 %874, %v30_v5   ;;  %v44_v11 = vld [vmem:[%s1022_s6] sm:$0xff] }
   0x8   :  { %835 = vmatmul.mubr.msk.f32.vlgmr.msra.gmra.mrb[2].mxu0 %vm53_vm1, %v29_v3  ;;  %837 = vmatprep.subr.mxu1 %v876_v0  ;;  %v794_v40 = vld [vmem:[%s1024_s3] ss:$0 sm:$0xff] }
   0x9   :  { %853 = vmatpush3.msk.msra.mxu0 %vm57_vm0, %v50_v2  ;;  %854 = vmatprep.mubr.msk.f32.mxu0 %vm877_vm2, %v876_v0  ;;  %v39_v46 = vld [vmem:[%s1023_s5] sm:$0xff] }
   0xa   :  { %857 = vmatprep.subr.mxu0 %v876_v0  ;;  %839 = vmatprep.mubr.msk.f32.mxu1 %vm877_vm2, %v876_v0 }
   0xb   :  { %139 = vperm.xlu0 %874, %v780_v7   ;;  %875 = vset.pattern.permute.xlu1 %v878_v6 }
   0xc   :  { %855 = vmatmul.mubr.msk.f32.vlgmr.msra.gmra.mrb[4].mxu0 %vm53_vm1, %v787_v8  ;;  %532 = vperm.xlu1 %875, %v781_v12  }
   0xd   :  { %858 = vmatpush3.msk.msra.mxu0 %vm57_vm0, %v49_v1  ;;  %859 = vmatprep.mubr.msk.f32.mxu0 %vm877_vm2, %v876_v0 }
   0xe   :  { %862 = vmatprep.subr.mxu0 %v876_v0 }
   0xf   :  { %767 = vperm.xlu0 %874, %v783_v9  }
  0x10   :  { %860 = vmatmul.mubr.msk.f32.vlgmr.msra.gmra.mrb[6].mxu0 %vm53_vm1, %v786_v10  ;;  %538 = vperm.xlu1 %875, %v782_v13  }
  0x11   :  { %863 = vmatpush3.msk.msra.mxu0 %vm57_vm0, %v51_v4  ;;  %864 = vmatprep.mubr.msk.f32.mxu0 %vm877_vm2, %v876_v0 }
  0x14   :  { %865 = vmatmul.mubr.msk.f32.vlgmr.msra.gmra.mrb[8].mxu0 %vm53_vm1, %v44_v11 }
  0x86   :  { %v134_v14 = vpop.permute.xlu0 %133 }
  0x8a   :  { %v140_v21 = vpop.permute.xlu0 %139 }
  0x8b   :  { %v533_v47 = vpop.permute.xlu1 %532 }
  0x8e   :  { %v768_v48 = vpop.permute.xlu0 %767 }
  0x8f   :  { %v539_v53 = vpop.permute.xlu1 %538 }
  0xd7   :  { %v127_v15 = vpop.f32.mrb[0].mxu0  ;;  %v215_v16 = vpop.f32.mrb[0].mxu1 }
  0xd8   :  { %v136_v17 = vmul.f32 %v134_v14, %v127_v15  ;;  %v219_v18 = vmul.f32 %v215_v16, %v134_v14  ;;  %v831_v19 = vpop.f32.mrb[1].mxu1  ;;  %v826_v20 = vpop.f32.mrb[1].mxu0 }
  0xda   :  { %v142_v22 = vadd.f32 %v140_v21, %v136_v17  ;;  %v220_v23 = vadd.f32 %v219_v18, %v140_v21 }
  0xdb   :  { %v293_v24 = vpop.f32.mrb[2].mxu0 }
  0xdc   :  { %v144_v25 = vmul.f32 0.1, %v142_v22  ;;  %v222_v26 = vmul.f32 0.1, %v220_v23  ;;  %v297_v27 = vmul.f32 %v293_v24, %v134_v14  ;;  %vm221_vm3 = vcmp.ge.f32.partialorder %v220_v23, 0.0  ;;  %v836_v28 = vpop.f32.mrb[3].mxu0 }
  0xdd   :  { %vm143_vm5 = vcmp.ge.f32.partialorder %v142_v22, 0.0 }
  0xde   :  { %v298_v30 = vadd.f32 %v297_v27, %v140_v21  ;;  %v223_v31 = vsel %vm221_vm3, %v220_v23, %v222_v26  ;;  %v145_v34 = vsel %vm143_vm5, %v142_v22, %v144_v25 }
  0xdf   :  { %838 = vmatpush3.msra.mxu1 %v223_v31  ;;  %v614_v32 = vpop.f32.mrb[4].mxu0 }
  0xe0   :  { %v300_v33 = vmul.f32 0.1, %v298_v30  ;;  %840 = vmatmul.mubr.msk.f32.vlgmr.msra.gmra.mrb[2].mxu1 %vm309_vm4, %v785_v29  ;;  %842 = vmatprep.subr.mxu1 %v876_v0  ;;  %v856_v35 = vpop.f32.mrb[5].mxu0  ;;  %vm299_vm6 = vcmp.ge.f32.partialorder %v298_v30, 0.0 }
  0xe1   :  { %843 = vmatpush3.msra.mxu1 %v145_v34  ;;  %844 = vmatprep.mubr.msk.f32.mxu1 %vm877_vm2, %v876_v0 }
  0xe2   :  { %847 = vmatprep.subr.mxu1 %v876_v0  ;;  %v301_v37 = vsel %vm299_vm6, %v298_v30, %v300_v33 }
  0xe3   :  { %v687_v36 = vpop.f32.mrb[6].mxu0  ;;  %v308_v43 = vmul.f32 %v794_v40, %v301_v37 }
  0xe4   :  { %v688_v38 = vadd.f32 %v687_v36, %v614_v32  ;;  %v861_v39 = vpop.f32.mrb[7].mxu0 }
  0xe7   :  { %v760_v42 = vpop.f32.mrb[8].mxu0 }
  0xe8   :  { %v764_v44 = vadd.f32 %v760_v42, %v688_v38  ;;  %845 = vmatmul.mubr.msk.f32.vlgmr.msra.gmra.mrb[2].mxu1 %vm309_vm4, %v784_v41  ;;  %v866_v45 = vpop.f32.mrb[9].mxu0 }
  0xe9   :  { %848 = vmatpush3.msra.mxu1 %v308_v43  ;;  %849 = vmatprep.mubr.msk.f32.mxu1 %vm877_vm2, %v876_v0 }
  0xea   :  { %v770_v49 = vadd.f32 %v768_v48, %v764_v44 }
  0xec   :  { %v772_v54 = vmul.f32 0.1, %v770_v49  ;;  %vm771_vm7 = vcmp.ge.f32.partialorder %v770_v49, 0.0 }
  0xee   :  { %v773_v58 = vsel %vm771_vm7, %v770_v49, %v772_v54 }
  0xf0   :  { %850 = vmatmul.mubr.msk.f32.vlgmr.msra.gmra.mrb[2].mxu1 %vm309_vm4, %v39_v46 }
 0x1c3   :  { %v525_v50 = vpop.f32.mrb[2].mxu1 }
 0x1c4   :  { %v535_v51 = vmul.f32 %v533_v47, %v525_v50  ;;  %v851_v52 = vpop.f32.mrb[3].mxu1 }
 0x1c6   :  { %v541_v55 = vadd.f32 %v539_v53, %v535_v51 }
 0x1c8   :  { %vm542_vm8 = vcmp.ge.f32.partialorder %v541_v55, 0.0  ;;  %v543_v56 = vmul.f32 0.1, %v541_v55 }
 0x1ca   :  { %v544_v57 = vsel %vm542_vm8, %v541_v55, %v543_v56 }
 0x1cb   :  { %v774_v59 = vadd.f32 %v773_v58, %v544_v57 }
 0x1cd   :  { %775 = vst [vmem:[%s1025_s8] sm:$0xff] %v774_v59 }

</bundles_post_ra>
